<compile_context>
chip_gen: v5e
topology: v5e:2x2
jax: 0.10.0
libtpu: 0.0.40
codegen_flags: <defaults>
</compile_context>

<pallas_src>
import jax
import jax.numpy as jnp
from jax.experimental import pallas as pl
from jax.experimental.pallas import tpu as pltpu

LEAKY_SLOPE = 0.01   # PyTorch F.leaky_relu default negative_slope
BN_EPS = 1e-5        # PyTorch BatchNorm1d default eps
LANE = 128


def _round_up(x, m):
    return ((x + m - 1) // m) * m


def _make_kernel(n_hidden, apply_sigmoid):
    def kernel(*refs):
        # refs = [x, (W', shift') * n_hidden, w_out_row, b_out, out]
        x_ref = refs[0]
        out_ref = refs[-1]
        h = x_ref[...].astype(jnp.float32)
        idx = 1
        for _ in range(n_hidden):
            w_ref, s_ref = refs[idx], refs[idx + 1]
            idx += 2
            # Linear + (folded bias & eval-mode BatchNorm): bf16 MXU, f32 accumulation.
            y = jnp.dot(h.astype(jnp.bfloat16), w_ref[...],
                        preferred_element_type=jnp.float32)
            y = y + s_ref[...]
            # LeakyReLU (f32 on VPU); Dropout is identity in eval mode.
            h = jnp.where(y > 0, y, LEAKY_SLOPE * y)
        w_out_ref, b_out_ref = refs[idx], refs[idx + 1]
        # Final Linear(out_features=1): broadcast-multiply + row-sum -> lane-dense output.
        logits = jnp.sum(h * w_out_ref[...], axis=-1)          # (tile_m,)
        logits = logits.reshape(out_ref.shape) + b_out_ref[...]  # (1, tile_m)
        if apply_sigmoid:
            logits = jax.nn.sigmoid(logits)
        out_ref[...] = logits

    return kernel


def discriminator_forward(x, params, *, sigmoid=False):
    """params: dict with 'hidden' = list of (W, b, gamma, beta, run_mean, run_var),
    'out' = (W_out, b_out).  Returns logits (or probs) of shape (batch,)."""
    n_hidden = len(params["hidden"])
    batch, in_dim = x.shape

    # ---- tile / padding choices ----------------------------------------------------
    tile_m = 256 if batch > 256 else _round_up(max(batch, 1), LANE)
    m_pad = _round_up(batch, tile_m)
    num_tiles = m_pad // tile_m
    d_in_pad = _round_up(in_dim, LANE)

    # ---- fold bias + BatchNorm into weights, pad, cast (plain-JAX glue) --------------
    flat_args = []
    in_specs = []

    x_p = jnp.zeros((m_pad, d_in_pad), jnp.bfloat16)
    x_p = x_p.at[:batch, :in_dim].set(x.astype(jnp.bfloat16))
    flat_args.append(x_p)
    in_specs.append(pl.BlockSpec((tile_m, d_in_pad), lambda i: (i, 0)))

    flops = 0
    weight_bytes = 0
    d_prev, d_prev_pad = in_dim, d_in_pad
    for (w, b, gamma, beta, mean, var) in params["hidden"]:
        d_out = w.shape[1]
        d_out_pad = _round_up(d_out, LANE)
        scale = gamma / jnp.sqrt(var + BN_EPS)
        shift = beta - mean * scale
        w_fold = w * scale[None, :]          # fold BN scale into columns of W
        b_fold = b * scale + shift           # fold Linear bias + BN shift

        w_p = jnp.zeros((d_prev_pad, d_out_pad), jnp.bfloat16)
        w_p = w_p.at[:d_prev, :d_out].set(w_fold.astype(jnp.bfloat16))
        s_p = jnp.zeros((1, d_out_pad), jnp.float32)
        s_p = s_p.at[0, :d_out].set(b_fold.astype(jnp.float32))

        flat_args += [w_p, s_p]
        in_specs += [
            pl.BlockSpec(w_p.shape, lambda i: (0, 0)),   # resident across batch tiles
            pl.BlockSpec(s_p.shape, lambda i: (0, 0)),
        ]
        flops += 2 * m_pad * d_prev_pad * d_out_pad
        weight_bytes += w_p.size * 2 + s_p.size * 4
        d_prev, d_prev_pad = d_out, d_out_pad

    w_out, b_out = params["out"]
    w_out_p = jnp.zeros((1, d_prev_pad), jnp.float32)
    w_out_p = w_out_p.at[0, :d_prev].set(w_out.reshape(-1).astype(jnp.float32))
    b_out_p = jnp.asarray(b_out, jnp.float32).reshape(1, 1)
    flat_args += [w_out_p, b_out_p]
    in_specs += [
        pl.BlockSpec(w_out_p.shape, lambda i: (0, 0)),
        pl.BlockSpec(b_out_p.shape, lambda i: (0, 0)),
    ]
    flops += 2 * m_pad * d_prev_pad
    weight_bytes += w_out_p.size * 4 + 4

    out_specs = pl.BlockSpec((1, tile_m), lambda i: (0, i))
    out_shape = jax.ShapeDtypeStruct((1, m_pad), jnp.float32)

    cost = pl.CostEstimate(
        flops=int(flops),
        transcendentals=int(m_pad if sigmoid else 0),
        bytes_accessed=int(x_p.size * 2 + weight_bytes + m_pad * 4),
    )

    kernel = _make_kernel(n_hidden, sigmoid)
    out = pl.pallas_call(
        kernel,
        grid=(num_tiles,),
        in_specs=in_specs,
        out_specs=out_specs,
        out_shape=out_shape,
        compiler_params=pltpu.CompilerParams(
            dimension_semantics=("parallel",),
            vmem_limit_bytes=48 * 1024 * 1024,
        ),
        cost_estimate=cost,
    )(*flat_args)
    return out.reshape(-1)[:batch]   # matches x.reshape(-1) in the PyTorch forward


def init_params(key, in_dim, layer_sizes):
    params = {"hidden": [], "out": None}
    d_prev = in_dim
    for h in layer_sizes:
        key, k_w, k_b, k_g, k_be, k_m, k_v = jax.random.split(key, 7)
        w = 0.1 * jax.random.normal(k_w, (d_prev, h), jnp.float32)
        b = 0.05 * jax.random.normal(k_b, (h,), jnp.float32)
        gamma = 1.0 + 0.1 * jax.random.normal(k_g, (h,), jnp.float32)
        beta = 0.05 * jax.random.normal(k_be, (h,), jnp.float32)
        run_mean = 0.1 * jax.random.normal(k_m, (h,), jnp.float32)
        run_var = jax.random.uniform(k_v, (h,), jnp.float32, 0.5, 1.5)
        params["hidden"].append((w, b, gamma, beta, run_mean, run_var))
        d_prev = h
    key, k_w, k_b = jax.random.split(key, 3)
    w_out = 0.1 * jax.random.normal(k_w, (d_prev, 1), jnp.float32)
    b_out = 0.05 * jax.random.normal(k_b, (1,), jnp.float32)
    params["out"] = (w_out, b_out)
    return params


def _reference_forward(x, params, *, sigmoid=False):
    """Mirrors the kernel numerics exactly (folded bias+BN, bf16 weights/activations,
    f32 accumulation) for a tight correctness check."""
    def bf(a):
        return a.astype(jnp.bfloat16).astype(jnp.float32)

    h = x.astype(jnp.float32)
    for (w, b, gamma, beta, mean, var) in params["hidden"]:
        scale = gamma / jnp.sqrt(var + BN_EPS)
        shift = beta - mean * scale
        w_fold = bf(w * scale[None, :])
        b_fold = (b * scale + shift).astype(jnp.float32)
        y = jnp.dot(bf(h), w_fold, preferred_element_type=jnp.float32) + b_fold
        h = jnp.where(y > 0, y, LEAKY_SLOPE * y)
    w_out, b_out = params["out"]
    logits = jnp.sum(h * w_out.reshape(1, -1).astype(jnp.float32), axis=-1) + b_out
    if sigmoid:
        logits = jax.nn.sigmoid(logits)
    return logits.reshape(-1)


def _reference_forward_f32(x, params, *, sigmoid=False):
    """Pure-f32 mathematical reference of the PyTorch eval-mode forward."""
    h = x.astype(jnp.float32)
    for (w, b, gamma, beta, mean, var) in params["hidden"]:
        y = h @ w + b
        y = (y - mean) / jnp.sqrt(var + BN_EPS) * gamma + beta
        h = jnp.where(y > 0, y, LEAKY_SLOPE * y)
    w_out, b_out = params["out"]
    logits = h @ w_out + b_out
    if sigmoid:
        logits = jax.nn.sigmoid(logits)
    return logits.reshape(-1)


if __name__ == "__main__":
    key = jax.random.PRNGKey(0)
    k_data, k_params = jax.random.split(key)

    batch, in_dim = 8, 16
    layer_sizes = [32, 32]        # Discriminator(layers=[32, 32])

    x = jax.random.normal(k_data, (batch, in_dim), jnp.float32)
    params = init_params(k_params, in_dim, layer_sizes)

    out = discriminator_forward(x, params, sigmoid=True)   # predict() path
    out = jax.block_until_ready(out)
    assert out.shape == (batch,)

    ref = _reference_forward(x, params, sigmoid=True)
    assert jnp.allclose(out, ref, atol=1e-4, rtol=1e-4), (out, ref)

    ref32 = _reference_forward_f32(x, params, sigmoid=True)
    assert jnp.allclose(out, ref32, atol=5e-2, rtol=5e-2), (out, ref32)

    # TODO(synk): train-mode semantics (batch-statistics BatchNorm, stochastic Dropout)
    # are not implemented; this kernel reproduces the eval/predict path only.
    print("KERNEL_OK")
</pallas_src>

<mosaic_0001>
module attributes {stable_mosaic.version = 11 : i64} {
  func.func @kernel(%arg0: i32, %arg1: memref<128x128xbf16, #tpu.memory_space<vmem>>, %arg2: memref<128x128xbf16, #tpu.memory_space<vmem>>, %arg3: memref<1x128xf32, #tpu.memory_space<vmem>>, %arg4: memref<128x128xbf16, #tpu.memory_space<vmem>>, %arg5: memref<1x128xf32, #tpu.memory_space<vmem>>, %arg6: memref<1x128xf32, #tpu.memory_space<vmem>>, %arg7: memref<1x1xf32, #tpu.memory_space<vmem>>, %arg8: memref<1x128xf32, #tpu.memory_space<vmem>>) attributes {dimension_semantics = [#tpu.dimension_semantics<parallel>], iteration_bounds = array<i64: 1>, scalar_prefetch = 0 : i64, scratch_operands = 0 : i64, tpu.core_type = #tpu.core_type<tc>, window_params = [{transform_indices = @transform_0, window_bounds = array<i64: 128, 128>}, {pipeline_mode = #tpu.pipeline_mode<synchronous>, transform_indices = @transform_1, window_bounds = array<i64: 128, 128>}, {pipeline_mode = #tpu.pipeline_mode<synchronous>, transform_indices = @transform_2, window_bounds = array<i64: 1, 128>}, {pipeline_mode = #tpu.pipeline_mode<synchronous>, transform_indices = @transform_3, window_bounds = array<i64: 128, 128>}, {pipeline_mode = #tpu.pipeline_mode<synchronous>, transform_indices = @transform_4, window_bounds = array<i64: 1, 128>}, {pipeline_mode = #tpu.pipeline_mode<synchronous>, transform_indices = @transform_5, window_bounds = array<i64: 1, 128>}, {pipeline_mode = #tpu.pipeline_mode<synchronous>, transform_indices = @transform_6, window_bounds = array<i64: 1, 1>}, {transform_indices = @transform_7, window_bounds = array<i64: 1, 128>}]} {
    %c0 = arith.constant 0 : index
    %c0_0 = arith.constant 0 : index
    %0 = vector.load %arg1[%c0, %c0_0] : memref<128x128xbf16, #tpu.memory_space<vmem>>, vector<128x128xbf16>
    %1 = arith.extf %0 : vector<128x128xbf16> to vector<128x128xf32>
    %2 = arith.truncf %1 : vector<128x128xf32> to vector<128x128xbf16>
    %c0_1 = arith.constant 0 : index
    %c0_2 = arith.constant 0 : index
    %3 = vector.load %arg2[%c0_1, %c0_2] : memref<128x128xbf16, #tpu.memory_space<vmem>>, vector<128x128xbf16>
    %cst = arith.constant dense<0.000000e+00> : vector<128x128xf32>
    %4 = tpu.matmul %2, %3, %cst {dimension_numbers = #tpu.dot_dimension_numbers<[1], [0], [0], [1], [0, 0, 1, 1], [], []>} : vector<128x128xbf16>, vector<128x128xbf16>, vector<128x128xf32> -> vector<128x128xf32>
    %c0_3 = arith.constant 0 : index
    %c0_4 = arith.constant 0 : index
    %5 = vector.load %arg3[%c0_3, %c0_4] : memref<1x128xf32, #tpu.memory_space<vmem>>, vector<1x128xf32>
    %6 = vector.broadcast %5 : vector<1x128xf32> to vector<128x128xf32>
    %7 = arith.addf %4, %6 : vector<128x128xf32>
    %cst_5 = arith.constant 0.000000e+00 : f32
    %8 = vector.broadcast %cst_5 : f32 to vector<128x128xf32>
    %9 = arith.cmpf ogt, %7, %8 : vector<128x128xf32>
    %cst_6 = arith.constant 0.00999999977 : f32
    %10 = vector.broadcast %cst_6 : f32 to vector<128x128xf32>
    %11 = arith.mulf %10, %7 : vector<128x128xf32>
    %12 = arith.select %9, %7, %11 : vector<128x128xi1>, vector<128x128xf32>
    %13 = arith.truncf %12 : vector<128x128xf32> to vector<128x128xbf16>
    %c0_7 = arith.constant 0 : index
    %c0_8 = arith.constant 0 : index
    %14 = vector.load %arg4[%c0_7, %c0_8] : memref<128x128xbf16, #tpu.memory_space<vmem>>, vector<128x128xbf16>
    %cst_9 = arith.constant dense<0.000000e+00> : vector<128x128xf32>
    %15 = tpu.matmul %13, %14, %cst_9 {dimension_numbers = #tpu.dot_dimension_numbers<[1], [0], [0], [1], [0, 0, 1, 1], [], []>} : vector<128x128xbf16>, vector<128x128xbf16>, vector<128x128xf32> -> vector<128x128xf32>
    %c0_10 = arith.constant 0 : index
    %c0_11 = arith.constant 0 : index
    %16 = vector.load %arg5[%c0_10, %c0_11] : memref<1x128xf32, #tpu.memory_space<vmem>>, vector<1x128xf32>
    %17 = vector.broadcast %16 : vector<1x128xf32> to vector<128x128xf32>
    %18 = arith.addf %15, %17 : vector<128x128xf32>
    %cst_12 = arith.constant 0.000000e+00 : f32
    %19 = vector.broadcast %cst_12 : f32 to vector<128x128xf32>
    %20 = arith.cmpf ogt, %18, %19 : vector<128x128xf32>
    %cst_13 = arith.constant 0.00999999977 : f32
    %21 = vector.broadcast %cst_13 : f32 to vector<128x128xf32>
    %22 = arith.mulf %21, %18 : vector<128x128xf32>
    %23 = arith.select %20, %18, %22 : vector<128x128xi1>, vector<128x128xf32>
    %c0_14 = arith.constant 0 : index
    %c0_15 = arith.constant 0 : index
    %24 = vector.load %arg6[%c0_14, %c0_15] : memref<1x128xf32, #tpu.memory_space<vmem>>, vector<1x128xf32>
    %25 = vector.broadcast %24 : vector<1x128xf32> to vector<128x128xf32>
    %26 = arith.mulf %23, %25 : vector<128x128xf32>
    %cst_16 = arith.constant dense<0.000000e+00> : vector<128xf32>
    %27 = vector.multi_reduction <add>, %26, %cst_16 [1] : vector<128x128xf32> to vector<128xf32>
    %28 = vector.shape_cast %27 : vector<128xf32> to vector<1x128xf32>
    %c0_17 = arith.constant 0 : index
    %c0_18 = arith.constant 0 : index
    %29 = vector.load %arg7[%c0_17, %c0_18] : memref<1x1xf32, #tpu.memory_space<vmem>>, vector<1x1xf32>
    %30 = vector.broadcast %29 : vector<1x1xf32> to vector<1x128xf32>
    %31 = arith.addf %28, %30 : vector<1x128xf32>
    %32 = arith.negf %31 : vector<1x128xf32>
    %33 = math.exp %32 : vector<1x128xf32>
    %cst_19 = arith.constant 1.000000e+00 : f32
    %34 = vector.broadcast %cst_19 : f32 to vector<1x128xf32>
    %35 = arith.addf %34, %33 : vector<1x128xf32>
    %36 = arith.divf %34, %35 : vector<1x128xf32>
    %c0_20 = arith.constant 0 : index
    %c0_21 = arith.constant 0 : index
    %37 = vector.load %arg8[%c0_20, %c0_21] : memref<1x128xf32, #tpu.memory_space<vmem>>, vector<1x128xf32>
    tpu.vector_store %arg8[%c0_20, %c0_21], %36 {strides = array<i32>} : memref<1x128xf32, #tpu.memory_space<vmem>>, vector<1x128xf32>,
    return
  }
  func.func @transform_0(%arg0: i32) -> (i32, i32) {
    %c0_i32 = arith.constant 0 : i32
    %c0_i32_0 = arith.constant 0 : i32
    return %arg0, %c0_i32 : i32, i32
  }
  func.func @transform_1(%arg0: i32) -> (i32, i32) {
    %c0_i32 = arith.constant 0 : i32
    %c0_i32_0 = arith.constant 0 : i32
    %c0_i32_1 = arith.constant 0 : i32
    return %c0_i32, %c0_i32_0 : i32, i32
  }
  func.func @transform_2(%arg0: i32) -> (i32, i32) {
    %c0_i32 = arith.constant 0 : i32
    %c0_i32_0 = arith.constant 0 : i32
    %c0_i32_1 = arith.constant 0 : i32
    return %c0_i32, %c0_i32_0 : i32, i32
  }
  func.func @transform_3(%arg0: i32) -> (i32, i32) {
    %c0_i32 = arith.constant 0 : i32
    %c0_i32_0 = arith.constant 0 : i32
    %c0_i32_1 = arith.constant 0 : i32
    return %c0_i32, %c0_i32_0 : i32, i32
  }
  func.func @transform_4(%arg0: i32) -> (i32, i32) {
    %c0_i32 = arith.constant 0 : i32
    %c0_i32_0 = arith.constant 0 : i32
    %c0_i32_1 = arith.constant 0 : i32
    return %c0_i32, %c0_i32_0 : i32, i32
  }
  func.func @transform_5(%arg0: i32) -> (i32, i32) {
    %c0_i32 = arith.constant 0 : i32
    %c0_i32_0 = arith.constant 0 : i32
    %c0_i32_1 = arith.constant 0 : i32
    return %c0_i32, %c0_i32_0 : i32, i32
  }
  func.func @transform_6(%arg0: i32) -> (i32, i32) {
    %c0_i32 = arith.constant 0 : i32
    %c0_i32_0 = arith.constant 0 : i32
    %c0_i32_1 = arith.constant 0 : i32
    return %c0_i32, %c0_i32_0 : i32, i32
  }
  func.func @transform_7(%arg0: i32) -> (i32, i32) {
    %c0_i32 = arith.constant 0 : i32
    %c0_i32_0 = arith.constant 0 : i32
    return %c0_i32, %arg0 : i32, i32
  }
}

</mosaic_0001>

<bundles_post_ra>
// kernel: tpu_custom_call.1
= control target key start
LH: loop header
LB: loop body
LE: loop exit
PB: predicated region body
PF: predicated region fallthrough
CT: control target
= control target key end

     0   :  { %s1905_s0 = inlined_call_operand.hbm [shape: bf16[128,128], index: 0, kind: input, shape index: {}]   ;;  %s1906_s1 = inlined_call_operand.hbm [shape: bf16[128,128], index: 1, kind: input, shape index: {}]   ;;  %s1907_s2 = inlined_call_operand.vmem [shape: f32[1,128], index: 2, kind: input, shape index: {}]   ;;  %s1908_s3 = inlined_call_operand.hbm [shape: bf16[128,128], index: 3, kind: input, shape index: {}]   ;;  %s1909_s4 = inlined_call_operand.vmem [shape: f32[1,128], index: 4, kind: input, shape index: {}]   ;;  %s1910_s5 = inlined_call_operand.vmem [shape: f32[1,128], index: 5, kind: input, shape index: {}]   ;;  %s1911_s6 = inlined_call_operand.<no memory space> [shape: f32[1,1], index: 6, kind: input, shape index: {}]   ;;  %s1912_s7 = inlined_call_operand.hbm [shape: f32[1,128], index: 7, kind: output, shape index: {}]  }
   0x1   :  { %v12_v0 = vstv %s1911_s6 }
   0x2   :  { %13 = vst [vmem:[#allocation2] sm:$0x1] %v12_v0 }
   0x3   :  { %14 = vsyncpa [#allocation4], 0 }
   0x4   :  { %15 = vsyncpa [#allocation7], 0 }
   0x5   :  { %16 = vsyncpa [#allocation5], 0  ;;  %s34_s28 = sshll.u32 %s1906_s1, 4  ;;  %s1285_s29 = smov [#allocation6]   ;;  %s35_s28 = int_to_ptr.hbm [resolvable:$true] %s34_s28 }
   0x6   :  { %s36_s30 = sshll.u32 %s1285_s29, 4  ;;  %s21_s10 = sshll.u32 %s1905_s0, 4  ;;  %s37_s30 = int_to_ptr.vmem [resolvable:$true] %s36_s30  ;;  %s22_s10 = int_to_ptr.hbm [resolvable:$true] %s21_s10 }
   0x7   :  { %s1286_s11 = smov 64   ;;  %s1287_s12 = smov 4  }
   0x8   :  { %42 = dma.hbm_to_vmem [thread:$0]  %s35_s28, 1024, %s37_s30, [#allocation7], %s1286_s11, %s1286_s11, %s1287_s12  }
   0x9   :  { %s1288_s6 = smov [#allocation3]   ;;  %s49_s16 = sshll.u32 %s1908_s3, 4  ;;  %s50_s16 = int_to_ptr.hbm [resolvable:$true] %s49_s16 }
   0xa   :  { %s23_s13 = sshll.u32 %s1288_s6, 4  ;;  %s1289_s1 = smov [#allocation8]   ;;  %s24_s13 = int_to_ptr.vmem [resolvable:$true] %s23_s13 }
   0xb   :  { %29 = dma.hbm_to_vmem [thread:$0]  %s22_s10, 1024, %s24_s13, [#allocation4], %s1286_s11, %s1286_s11, %s1287_s12  }
   0xc   :  { %s51_s17 = sshll.u32 %s1289_s1, 4  ;;  %s52_s17 = int_to_ptr.vmem [resolvable:$true] %s51_s17 }
   0xd   :  { %57 = dma.hbm_to_vmem [thread:$0]  %s50_s16, 1024, %s52_s17, [#allocation7], %s1286_s11, %s1286_s11, %s1287_s12  }
   0xe   :  { %1279 = dma.done.wait [#allocation4], 1024  }
   0xf   :  { %1280 = vsyncadd [#allocation4], 4294966272 }
  0x10   :  { %1281 = dma.done.wait [#allocation7], 2048  }
  0x11   :  { %1282 = vsyncadd [#allocation7], 4294965248  ;;  %v1083_v1 = vld [vmem:[#allocation6 + $0x38] sm:$0xff]  ;;  %v1082_v2 = vld [vmem:[#allocation6 + $0x30] sm:$0xff]  ;;  %s945_s23 = sshll.u32 %s1912_s7, 4  ;;  %s946_s23 = int_to_ptr.hbm [resolvable:$true] %s945_s23 }
  0x12   :  { %208 = vmatpush.bf16.msra.mxu0 %v1083_v1  ;;  %1092 = vmatpush.bf16.msra.mxu2 %v1083_v1  ;;  %v1081_v3 = vld [vmem:[#allocation6 + $0x28] sm:$0xff]  ;;  %v1080_v4 = vld [vmem:[#allocation6 + $0x20] sm:$0xff]  ;;  %v1079_v5 = vld [vmem:[#allocation6 + $0x18] sm:$0xff] }
  0x13   :  { %v1078_v6 = vld [vmem:[#allocation6 + $0x10] sm:$0xff]  ;;  %v1077_v7 = vld [vmem:[#allocation6 + $0x8] sm:$0xff]  ;;  %v1076_v8 = vld [vmem:[#allocation6] sm:$0xff] }
  0x14   :  { %v1068_v9 = vld [vmem:[#allocation3] sm:$0xff]  ;;  %v1069_v11 = vld [vmem:[#allocation3 + $0x8] sm:$0xff]  ;;  %v1091_v13 = vld [vmem:[#allocation8 + $0x38] sm:$0xff] }
  0x15   :  { %v1072_v10 = vld [vmem:[#allocation3 + $0x20] sm:$0xff]  ;;  %v1073_v12 = vld [vmem:[#allocation3 + $0x28] sm:$0xff]  ;;  %381 = vmatpush.bf16.msra.mxu1 %v1091_v13  ;;  %v1090_v14 = vld [vmem:[#allocation8 + $0x30] sm:$0xff]  ;;  %1100 = vmatpush.bf16.msra.mxu3 %v1091_v13 }
  0x16   :  { %209 = vmatpush.bf16.msra.mxu0 %v1082_v2  ;;  %1093 = vmatpush.bf16.msra.mxu2 %v1082_v2  ;;  %v1089_v15 = vld [vmem:[#allocation8 + $0x28] sm:$0xff]  ;;  %v1088_v16 = vld [vmem:[#allocation8 + $0x20] sm:$0xff]  ;;  %v1070_v17 = vld [vmem:[#allocation3 + $0x10] sm:$0xff]  ;;  %v1290_v2 = vmov 0  }
  0x17   :  { %v1074_v18 = vld [vmem:[#allocation3 + $0x30] sm:$0xff]  ;;  %v1071_v19 = vld [vmem:[#allocation3 + $0x18] sm:$0xff]  ;;  %v1085_v23 = vld [vmem:[#allocation8 + $0x8] sm:$0xff]  ;;  %1115 = vset.pattern.permute.xlu0 %v1290_v2 }
  0x18   :  { %v1075_v20 = vld [vmem:[#allocation3 + $0x38] sm:$0xff]  ;;  %v1086_v22 = vld [vmem:[#allocation8 + $0x10] sm:$0xff]  ;;  %v1084_v24 = vld [vmem:[#allocation8] sm:$0xff] }
  0x19   :  { %382 = vmatpush.bf16.msra.mxu1 %v1090_v14  ;;  %1101 = vmatpush.bf16.msra.mxu3 %v1090_v14  ;;  %v1087_v21 = vld [vmem:[#allocation8 + $0x18] sm:$0xff] }
  0x1a   :  { %210 = vmatpush.bf16.msra.mxu0 %v1081_v3  ;;  %1094 = vmatpush.bf16.msra.mxu2 %v1081_v3  ;;  %v1347_v26 = vld [vmem:[%s1907_s2] ss:$0 sm:$0xff] }
  0x1b   :  { %v530_v1 = vld [vmem:[#allocation2] sm:$0x1] }
  0x1c   :  { %533 = vperm.xlu0 %1115, %v530_v1  }
  0x1d   :  { %383 = vmatpush.bf16.msra.mxu1 %v1089_v15  ;;  %1102 = vmatpush.bf16.msra.mxu3 %v1089_v15 }
  0x1e   :  { %211 = vmatpush.bf16.msra.mxu0 %v1080_v4  ;;  %1095 = vmatpush.bf16.msra.mxu2 %v1080_v4 }
  0x21   :  { %384 = vmatpush.bf16.msra.mxu1 %v1088_v16  ;;  %1103 = vmatpush.bf16.msra.mxu3 %v1088_v16 }
  0x22   :  { %212 = vmatpush.bf16.msra.mxu0 %v1079_v5  ;;  %1096 = vmatpush.bf16.msra.mxu2 %v1079_v5 }
  0x25   :  { %385 = vmatpush.bf16.msra.mxu1 %v1087_v21  ;;  %1104 = vmatpush.bf16.msra.mxu3 %v1087_v21 }
  0x26   :  { %213 = vmatpush.bf16.msra.mxu0 %v1078_v6  ;;  %1097 = vmatpush.bf16.msra.mxu2 %v1078_v6 }
  0x29   :  { %386 = vmatpush.bf16.msra.mxu1 %v1086_v22  ;;  %1105 = vmatpush.bf16.msra.mxu3 %v1086_v22 }
  0x2a   :  { %214 = vmatpush.bf16.msra.mxu0 %v1077_v7  ;;  %1098 = vmatpush.bf16.msra.mxu2 %v1077_v7 }
  0x2d   :  { %387 = vmatpush.bf16.msra.mxu1 %v1085_v23  ;;  %1106 = vmatpush.bf16.msra.mxu3 %v1085_v23 }
  0x2e   :  { %215 = vmatpush.bf16.msra.mxu0 %v1076_v8  ;;  %1099 = vmatpush.bf16.msra.mxu2 %v1076_v8 }
  0x31   :  { %216 = vmatmul.bf16.vlgmr.msra.gmra.mxu0 %v1068_v9  ;;  %236 = vmatmul.bf16.vlgmr.msra.gmra.mxu2 %v1072_v10 }
  0x32   :  { %388 = vmatpush.bf16.msra.mxu1 %v1084_v24  ;;  %1107 = vmatpush.bf16.msra.mxu3 %v1084_v24 }
  0x41   :  { %221 = vmatmul.bf16.gmra.mxu0 %v1069_v11  ;;  %241 = vmatmul.bf16.gmra.mxu2 %v1073_v12 }
  0x51   :  { %226 = vmatmul.bf16.gmra.mxu0 %v1070_v17  ;;  %246 = vmatmul.bf16.gmra.mxu2 %v1074_v18 }
  0x61   :  { %231 = vmatmul.bf16.gmra.mxu0 %v1071_v19  ;;  %251 = vmatmul.bf16.gmra.mxu2 %v1075_v20 }
  0xae   :  { %v217_v25 = vpop.f32.mrf.mxu0 }
  0xaf   :  { %v218_v27 = vadd.f32 %v1347_v26, %v217_v25 }
  0xb1   :  { %v273_v30 = vmul.f32 0.01, %v218_v27  ;;  %vm257_vm0 = vcmp.gt.f32.partialorder %v218_v27, 0.0 }
  0xb3   :  { %v289_v34 = vsel %vm257_vm0, %v218_v27, %v273_v30 }
  0xb4   :  { %v237_v28 = vpop.f32.mrf.mxu2 }
  0xb5   :  { %v238_v32 = vadd.f32 %v1347_v26, %v237_v28 }
  0xb6   :  { %v219_v29 = vpop.f32.mrf.mxu0 }
  0xb7   :  { %v220_v31 = vadd.f32 %v1347_v26, %v219_v29  ;;  %v281_v38 = vmul.f32 0.01, %v238_v32  ;;  %vm265_vm2 = vcmp.gt.f32.partialorder %v238_v32, 0.0 }
  0xb9   :  { %v274_v33 = vmul.f32 0.01, %v220_v31  ;;  %vm258_vm1 = vcmp.gt.f32.partialorder %v220_v31, 0.0  ;;  %v297_v42 = vsel %vm265_vm2, %v238_v32, %v281_v38 }
  0xbb   :  { %v290_v35 = vsel %vm258_vm1, %v220_v31, %v274_v33 }
  0xbc   :  { %v239_v36 = vpop.f32.mrf.mxu2  ;;  %v305_v37 = vpack.c.bf16 %v290_v35, %v289_v34 }
  0xbd   :  { %v240_v39 = vadd.f32 %v1347_v26, %v239_v36 }
  0xbe   :  { %v222_v40 = vpop.f32.mrf.mxu0  ;;  %389 = vmatmul.bf16.vlgmr.msra.gmra.mxu1 %v305_v37  ;;  %v1368_v37 = vld [vmem:[%s1909_s4] ss:$0 sm:$0xff]  ;;  %s1291_s4 = smov [#allocation9]  }
  0xbf   :  { %v282_v41 = vmul.f32 0.01, %v240_v39  ;;  %vm266_vm3 = vcmp.gt.f32.partialorder %v240_v39, 0.0  ;;  %v223_v45 = vadd.f32 %v1347_v26, %v222_v40 }
  0xc1   :  { %v298_v43 = vsel %vm266_vm3, %v240_v39, %v282_v41  ;;  %v275_v48 = vmul.f32 0.01, %v223_v45  ;;  %vm259_vm4 = vcmp.gt.f32.partialorder %v223_v45, 0.0 }
  0xc2   :  { %v309_v44 = vpack.c.bf16 %v298_v43, %v297_v42 }
  0xc3   :  { %v291_v52 = vsel %vm259_vm4, %v223_v45, %v275_v48 }
  0xc4   :  { %v242_v46 = vpop.f32.mrf.mxu2  ;;  %409 = vmatmul.bf16.vlgmr.msra.gmra.mxu3 %v309_v44 }
  0xc5   :  { %v243_v50 = vadd.f32 %v1347_v26, %v242_v46 }
  0xc6   :  { %v224_v47 = vpop.f32.mrf.mxu0 }
  0xc7   :  { %v225_v49 = vadd.f32 %v1347_v26, %v224_v47  ;;  %v283_v56 = vmul.f32 0.01, %v243_v50  ;;  %vm267_vm6 = vcmp.gt.f32.partialorder %v243_v50, 0.0 }
  0xc9   :  { %v276_v51 = vmul.f32 0.01, %v225_v49  ;;  %vm260_vm5 = vcmp.gt.f32.partialorder %v225_v49, 0.0  ;;  %v299_v60 = vsel %vm267_vm6, %v243_v50, %v283_v56 }
  0xcb   :  { %v292_v53 = vsel %vm260_vm5, %v225_v49, %v276_v51 }
  0xcc   :  { %v244_v54 = vpop.f32.mrf.mxu2  ;;  %v306_v55 = vpack.c.bf16 %v292_v53, %v291_v52 }
  0xcd   :  { %v245_v57 = vadd.f32 %v1347_v26, %v244_v54 }
  0xce   :  { %v227_v58 = vpop.f32.mrf.mxu0  ;;  %394 = vmatmul.bf16.gmra.mxu1 %v306_v55 }
  0xcf   :  { %v284_v59 = vmul.f32 0.01, %v245_v57  ;;  %vm268_vm7 = vcmp.gt.f32.partialorder %v245_v57, 0.0  ;;  %v228_v63 = vadd.f32 %v1347_v26, %v227_v58 }
  0xd1   :  { %v300_v61 = vsel %vm268_vm7, %v245_v57, %v284_v59  ;;  %v277_v4 = vmul.f32 0.01, %v228_v63  ;;  %vm261_vm8 = vcmp.gt.f32.partialorder %v228_v63, 0.0 }
  0xd2   :  { %v310_v62 = vpack.c.bf16 %v300_v61, %v299_v60 }
  0xd3   :  { %v293_v8 = vsel %vm261_vm8, %v228_v63, %v277_v4 }
  0xd4   :  { %v247_v0 = vpop.f32.mrf.mxu2  ;;  %414 = vmatmul.bf16.gmra.mxu3 %v310_v62 }
  0xd5   :  { %v248_v6 = vadd.f32 %v1347_v26, %v247_v0 }
  0xd6   :  { %v229_v3 = vpop.f32.mrf.mxu0 }
  0xd7   :  { %v230_v5 = vadd.f32 %v1347_v26, %v229_v3  ;;  %v285_v12 = vmul.f32 0.01, %v248_v6  ;;  %vm269_vm10 = vcmp.gt.f32.partialorder %v248_v6, 0.0 }
  0xd9   :  { %v278_v7 = vmul.f32 0.01, %v230_v5  ;;  %vm262_vm9 = vcmp.gt.f32.partialorder %v230_v5, 0.0  ;;  %v301_v16 = vsel %vm269_vm10, %v248_v6, %v285_v12 }
  0xdb   :  { %v294_v9 = vsel %vm262_vm9, %v230_v5, %v278_v7 }
  0xdc   :  { %v249_v10 = vpop.f32.mrf.mxu2  ;;  %v307_v11 = vpack.c.bf16 %v294_v9, %v293_v8 }
  0xdd   :  { %v250_v13 = vadd.f32 %v1347_v26, %v249_v10 }
  0xde   :  { %v232_v14 = vpop.f32.mrf.mxu0  ;;  %399 = vmatmul.bf16.gmra.mxu1 %v307_v11 }
  0xdf   :  { %v286_v15 = vmul.f32 0.01, %v250_v13  ;;  %vm270_vm11 = vcmp.gt.f32.partialorder %v250_v13, 0.0  ;;  %v233_v19 = vadd.f32 %v1347_v26, %v232_v14 }
  0xe1   :  { %v302_v17 = vsel %vm270_vm11, %v250_v13, %v286_v15  ;;  %v279_v22 = vmul.f32 0.01, %v233_v19  ;;  %vm263_vm12 = vcmp.gt.f32.partialorder %v233_v19, 0.0 }
  0xe2   :  { %v311_v18 = vpack.c.bf16 %v302_v17, %v301_v16 }
  0xe3   :  { %v295_v27 = vsel %vm263_vm12, %v233_v19, %v279_v22 }
  0xe4   :  { %v252_v20 = vpop.f32.mrf.mxu2  ;;  %419 = vmatmul.bf16.gmra.mxu3 %v311_v18 }
  0xe5   :  { %v253_v24 = vadd.f32 %v1347_v26, %v252_v20 }
  0xe6   :  { %v234_v21 = vpop.f32.mrf.mxu0 }
  0xe7   :  { %v235_v23 = vadd.f32 %v1347_v26, %v234_v21  ;;  %v287_v31 = vmul.f32 0.01, %v253_v24  ;;  %vm271_vm14 = vcmp.gt.f32.partialorder %v253_v24, 0.0 }
  0xe9   :  { %v280_v25 = vmul.f32 0.01, %v235_v23  ;;  %vm264_vm13 = vcmp.gt.f32.partialorder %v235_v23, 0.0  ;;  %v303_v34 = vsel %vm271_vm14, %v253_v24, %v287_v31 }
  0xeb   :  { %v296_v28 = vsel %vm264_vm13, %v235_v23, %v280_v25 }
  0xec   :  { %v254_v29 = vpop.f32.mrf.mxu2  ;;  %v308_v30 = vpack.c.bf16 %v296_v28, %v295_v27 }
  0xed   :  { %v255_v32 = vadd.f32 %v1347_v26, %v254_v29  ;;  %v1374_v26 = vld [vmem:[%s1910_s5] ss:$0 sm:$0xff]  ;;  %s943_s5 = sshll.u32 %s1291_s4, 4  ;;  %s944_s5 = int_to_ptr.vmem [resolvable:$true] %s943_s5 }
  0xee   :  { %404 = vmatmul.bf16.gmra.mxu1 %v308_v30 }
  0xef   :  { %v288_v33 = vmul.f32 0.01, %v255_v32  ;;  %vm272_vm15 = vcmp.gt.f32.partialorder %v255_v32, 0.0 }
  0xf1   :  { %v304_v35 = vsel %vm272_vm15, %v255_v32, %v288_v33 }
  0xf2   :  { %v312_v36 = vpack.c.bf16 %v304_v35, %v303_v34 }
  0xf4   :  { %424 = vmatmul.bf16.gmra.mxu3 %v312_v36 }
 0x13b   :  { %v390_v38 = vpop.f32.mrf.mxu1 }
 0x13c   :  { %v391_v39 = vadd.f32 %v1368_v37, %v390_v38 }
 0x13e   :  { %v446_v40 = vmul.f32 0.01, %v391_v39  ;;  %vm430_vm0 = vcmp.gt.f32.partialorder %v391_v39, 0.0 }
 0x140   :  { %v462_v41 = vsel %vm430_vm0, %v391_v39, %v446_v40 }
 0x141   :  { %v482_v42 = vmul.f32 %v1374_v26, %v462_v41 }
 0x143   :  { %v392_v43 = vpop.f32.mrf.mxu1  ;;  %498 = vadd.xlane.f32.xlu0 %v482_v42 }
 0x144   :  { %v393_v44 = vadd.f32 %v1368_v37, %v392_v43 }
 0x146   :  { %v447_v45 = vmul.f32 0.01, %v393_v44  ;;  %vm431_vm1 = vcmp.gt.f32.partialorder %v393_v44, 0.0 }
 0x147   :  { %v410_v46 = vpop.f32.mrf.mxu3 }
 0x148   :  { %v411_v47 = vadd.f32 %v1368_v37, %v410_v46  ;;  %v463_v48 = vsel %vm431_vm1, %v393_v44, %v447_v45 }
 0x149   :  { %v483_v49 = vmul.f32 %v1374_v26, %v463_v48 }
 0x14a   :  { %v454_v50 = vmul.f32 0.01, %v411_v47  ;;  %vm438_vm2 = vcmp.gt.f32.partialorder %v411_v47, 0.0 }
 0x14b   :  { %v395_v51 = vpop.f32.mrf.mxu1  ;;  %500 = vadd.xlane.f32.xlu1 %v483_v49 }
 0x14c   :  { %v396_v52 = vadd.f32 %v1368_v37, %v395_v51  ;;  %v470_v53 = vsel %vm438_vm2, %v411_v47, %v454_v50 }
 0x14d   :  { %v490_v54 = vmul.f32 %v1374_v26, %v470_v53 }
 0x14e   :  { %v448_v55 = vmul.f32 0.01, %v396_v52  ;;  %vm432_vm3 = vcmp.gt.f32.partialorder %v396_v52, 0.0 }
 0x14f   :  { %v412_v56 = vpop.f32.mrf.mxu3  ;;  %514 = vadd.xlane.f32.xlu2 %v490_v54 }
 0x150   :  { %v413_v57 = vadd.f32 %v1368_v37, %v412_v56  ;;  %v464_v58 = vsel %vm432_vm3, %v396_v52, %v448_v55  ;;  %v534_v56 = vpop.permute.xlu0 %533 }
 0x151   :  { %v484_v59 = vmul.f32 %v1374_v26, %v464_v58 }
 0x152   :  { %v455_v60 = vmul.f32 0.01, %v413_v57  ;;  %vm439_vm4 = vcmp.gt.f32.partialorder %v413_v57, 0.0 }
 0x153   :  { %v397_v61 = vpop.f32.mrf.mxu1  ;;  %502 = vadd.xlane.f32.xlu1 %v484_v59 }
 0x154   :  { %v398_v62 = vadd.f32 %v1368_v37, %v397_v61  ;;  %v471_v0 = vsel %vm439_vm4, %v413_v57, %v455_v60  ;;  %v1407_v57 = vperm.slane %v534_v56, 0 }
 0x155   :  { %v491_v5 = vmul.f32 %v1374_v26, %v471_v0 }
 0x156   :  { %v449_v63 = vmul.f32 0.01, %v398_v62  ;;  %vm433_vm5 = vcmp.gt.f32.partialorder %v398_v62, 0.0 }
 0x157   :  { %v415_v1 = vpop.f32.mrf.mxu3 }
 0x158   :  { %v416_v2 = vadd.f32 %v1368_v37, %v415_v1  ;;  %v465_v3 = vsel %vm433_vm5, %v398_v62, %v449_v63 }
 0x159   :  { %v485_v4 = vmul.f32 %v1374_v26, %v465_v3 }
 0x15a   :  { %v456_v6 = vmul.f32 0.01, %v416_v2  ;;  %vm440_vm6 = vcmp.gt.f32.partialorder %v416_v2, 0.0 }
 0x15b   :  { %v400_v7 = vpop.f32.mrf.mxu1  ;;  %504 = vadd.xlane.f32.xlu2 %v485_v4  ;;  %516 = vadd.xlane.f32.xlu1 %v491_v5 }
 0x15c   :  { %v401_v8 = vadd.f32 %v1368_v37, %v400_v7  ;;  %v472_v9 = vsel %vm440_vm6, %v416_v2, %v456_v6 }
 0x15d   :  { %v492_v12 = vmul.f32 %v1374_v26, %v472_v9 }
 0x15e   :  { %v450_v13 = vmul.f32 0.01, %v401_v8  ;;  %vm434_vm8 = vcmp.gt.f32.partialorder %v401_v8, 0.0 }
 0x15f   :  { %v417_v10 = vpop.f32.mrf.mxu3 }
 0x160   :  { %v418_v11 = vadd.f32 %v1368_v37, %v417_v10  ;;  %v466_v20 = vsel %vm434_vm8, %v401_v8, %v450_v13 }
 0x161   :  { %v486_v23 = vmul.f32 %v1374_v26, %v466_v20 }
 0x162   :  { %v457_v14 = vmul.f32 0.01, %v418_v11  ;;  %vm441_vm7 = vcmp.gt.f32.partialorder %v418_v11, 0.0 }
 0x163   :  { %v402_v15 = vpop.f32.mrf.mxu1  ;;  %518 = vadd.xlane.f32.xlu2 %v492_v12 }
 0x164   :  { %v403_v16 = vadd.f32 %v1368_v37, %v402_v15  ;;  %v473_v17 = vsel %vm441_vm7, %v418_v11, %v457_v14 }
 0x165   :  { %v493_v18 = vmul.f32 %v1374_v26, %v473_v17 }
 0x166   :  { %v451_v19 = vmul.f32 0.01, %v403_v16  ;;  %vm435_vm9 = vcmp.gt.f32.partialorder %v403_v16, 0.0 }
 0x167   :  { %v420_v21 = vpop.f32.mrf.mxu3  ;;  %520 = vadd.xlane.f32.xlu1 %v493_v18 }
 0x168   :  { %v421_v22 = vadd.f32 %v1368_v37, %v420_v21  ;;  %v467_v25 = vsel %vm435_vm9, %v403_v16, %v451_v19  ;;  %v873_v21 = vlaneseq }
 0x169   :  { %v487_v28 = vmul.f32 %v1374_v26, %v467_v25 }
 0x16a   :  { %v458_v24 = vmul.f32 0.01, %v421_v22  ;;  %vm442_vm10 = vcmp.gt.f32.partialorder %v421_v22, 0.0 }
 0x16b   :  { %v405_v27 = vpop.f32.mrf.mxu1  ;;  %506 = vadd.xlane.f32.xlu2 %v486_v23 }
 0x16c   :  { %v406_v29 = vadd.f32 %v1368_v37, %v405_v27  ;;  %v474_v30 = vsel %vm442_vm10, %v421_v22, %v458_v24  ;;  %v1437_v27 = vand.u32 127, %v873_v21 }
 0x16d   :  { %v494_v32 = vmul.f32 %v1374_v26, %v474_v30 }
 0x16e   :  { %v452_v33 = vmul.f32 0.01, %v406_v29  ;;  %vm436_vm11 = vcmp.gt.f32.partialorder %v406_v29, 0.0  ;;  %v1476_v56 = vadd.s32 4294967272, %v1437_v27 }
 0x16f   :  { %v422_v31 = vpop.f32.mrf.mxu3  ;;  %508 = vadd.xlane.f32.xlu1 %v487_v28 }
 0x170   :  { %v423_v36 = vadd.f32 %v1368_v37, %v422_v31  ;;  %v468_v39 = vsel %vm436_vm11, %v406_v29, %v452_v33  ;;  %vm878_vm11 = vcmask 130112  }
 0x171   :  { %v488_v43 = vmul.f32 %v1374_v26, %v468_v39 }
 0x172   :  { %v459_v45 = vmul.f32 0.01, %v423_v36  ;;  %vm443_vm14 = vcmp.gt.f32.partialorder %v423_v36, 0.0 }
 0x173   :  { %v407_v34 = vpop.f32.mrf.mxu1  ;;  %522 = vadd.xlane.f32.xlu2 %v494_v32 }
 0x174   :  { %v408_v35 = vadd.f32 %v1368_v37, %v407_v34  ;;  %v475_v48 = vsel %vm443_vm14, %v423_v36, %v459_v45  ;;  %v1446_v34 = vadd.s32 4294967288, %v1437_v27 }
 0x175   :  { %v495_v52 = vmul.f32 %v1374_v26, %v475_v48 }
 0x176   :  { %v453_v38 = vmul.f32 0.01, %v408_v35  ;;  %vm437_vm12 = vcmp.gt.f32.partialorder %v408_v35, 0.0 }
 0x177   :  { %v425_v40 = vpop.f32.mrf.mxu3 }
 0x178   :  { %v426_v41 = vadd.f32 %v1368_v37, %v425_v40  ;;  %v469_v42 = vsel %vm437_vm12, %v408_v35, %v453_v38 }
 0x179   :  { %v489_v44 = vmul.f32 %v1374_v26, %v469_v42  ;;  %v1453_v42 = vadd.s32 4294967232, %v1437_v27 }
 0x17a   :  { %v460_v46 = vmul.f32 0.01, %v426_v41  ;;  %vm444_vm13 = vcmp.gt.f32.partialorder %v426_v41, 0.0 }
 0x17b   :  { %510 = vadd.xlane.f32.xlu2 %v488_v43  ;;  %512 = vadd.xlane.f32.xlu1 %v489_v44 }
 0x17c   :  { %v476_v47 = vsel %vm444_vm13, %v426_v41, %v460_v46  ;;  %v1460_v46 = vadd.s32 4294967280, %v1437_v27 }
 0x17d   :  { %v496_v51 = vmul.f32 %v1374_v26, %v476_v47 }
 0x17f   :  { %v427_v49 = vpop.f32.mrf.mxu3 }
 0x180   :  { %v428_v50 = vadd.f32 %v1368_v37, %v427_v49 }
 0x182   :  { %v461_v53 = vmul.f32 0.01, %v428_v50  ;;  %vm445_vm15 = vcmp.gt.f32.partialorder %v428_v50, 0.0 }
 0x183   :  { %526 = vadd.xlane.f32.xlu2 %v496_v51  ;;  %524 = vadd.xlane.f32.xlu1 %v495_v52 }
 0x184   :  { %v477_v54 = vsel %vm445_vm15, %v428_v50, %v461_v53 }
 0x185   :  { %v497_v55 = vmul.f32 %v1374_v26, %v477_v54 }
 0x187   :  { %528 = vadd.xlane.f32.xlu0 %v497_v55 }
 0x1b6   :  { %v499_v58 = vpop.xlane.xlu0 %498 }
 0x1b7   :  { %v537_v59 = vadd.f32 %v1407_v57, %v499_v58 }
 0x1b9   :  { %v1052_v60 = vmul.f32 -1.442695, %v537_v59 }
 0x1bb   :  { %1119 = vpow2.f32 %v1052_v60  ;;  %v1483_v60 = vadd.s32 4294967224, %v1437_v27 }
 0x1be   :  { %v501_v37 = vpop.xlane.xlu1 %500 }
 0x1bf   :  { %v538_v61 = vadd.f32 %v1407_v57, %v501_v37 }
 0x1c1   :  { %v1053_v62 = vmul.f32 -1.442695, %v538_v61  ;;  %v1120_v0 = vpop.eup %1119 }
 0x1c2   :  { %v515_v63 = vpop.xlane.xlu2 %514  ;;  %v1412_v26 = vadd.f32 1.0, %v1120_v0 }
 0x1c3   :  { %1121 = vpow2.f32 %v1053_v62  ;;  %v545_v1 = vadd.f32 %v1407_v57, %v515_v63 }
 0x1c4   :  { %v628_v30 = vand.u32 2147483648, %v1412_v26  ;;  %v626_v41 = vand.u32 2147483647, %v1412_v26  ;;  %vm622_vm0 = vweird.f32 %v1412_v26 }
 0x1c5   :  { %v1060_v2 = vmul.f32 -1.442695, %v545_v1 }
 0x1c6   :  { %v503_v3 = vpop.xlane.xlu1 %502  ;;  %v629_v47 = vor.u32 1.1754944e-38, %v628_v30  ;;  %vm1470_vm2 = vcmp.eq.f32.partialorder %v626_v41, 8.507059e+37 }
 0x1c7   :  { %1123 = vpow2.f32 %v1060_v2  ;;  %v539_v4 = vadd.f32 %v1407_v57, %v503_v3 }
 0x1c8   :  { %1125 = vrcp.f32 %v1412_v26 }
 0x1c9   :  { %v1122_v5 = vpop.eup %1121  ;;  %v1054_v6 = vmul.f32 -1.442695, %v539_v4 }
 0x1ca   :  { %v1416_v7 = vadd.f32 1.0, %v1122_v5 }
 0x1cb   :  { %1127 = vpow2.f32 %v1054_v6  ;;  %v1508_v6 = vadd.s32 4294967216, %v1437_v27 }
 0x1cc   :  { %1129 = vrcp.f32 %v1416_v7  ;;  %v641_v44 = vand.u32 2147483647, %v1416_v7  ;;  %v643_v45 = vand.u32 2147483648, %v1416_v7  ;;  %vm637_vm3 = vweird.f32 %v1416_v7 }
 0x1cd   :  { %v1124_v8 = vpop.eup %1123 }
 0x1ce   :  { %v1419_v9 = vadd.f32 1.0, %v1124_v8  ;;  %v505_v10 = vpop.xlane.xlu2 %504  ;;  %v517_v11 = vpop.xlane.xlu1 %516  ;;  %vm1478_vm4 = vcmp.eq.f32.partialorder %v641_v44, 8.507059e+37  ;;  %v644_v59 = vor.u32 1.1754944e-38, %v643_v45 }
 0x1cf   :  { %v540_v12 = vadd.f32 %v1407_v57, %v505_v10  ;;  %v546_v13 = vadd.f32 %v1407_v57, %v517_v11  ;;  %v1423_v14 = vpop.eup %1125 }
 0x1d0   :  { %1131 = vrcp.f32 %v1419_v9  ;;  %v618_v20 = vmul.f32 %v1423_v14, %v1412_v26  ;;  %vm623_vm1 = vweird.f32 %v1423_v14  ;;  %vm742_vm7 = vweird.f32 %v1419_v9 }
 0x1d1   :  { %v1128_v15 = vpop.eup %1127  ;;  %v1055_v16 = vmul.f32 -1.442695, %v540_v12  ;;  %v1061_v17 = vmul.f32 -1.442695, %v546_v13  ;;  %vm1493_vm6 = vmor %vm622_vm0, %vm623_vm1  ;;  %v746_v1 = vand.u32 2147483647, %v1419_v9 }
 0x1d2   :  { %v1426_v18 = vpop.eup %1129  ;;  %v1428_v19 = vadd.f32 1.0, %v1128_v15  ;;  %v619_v25 = vsub.f32 1.0, %v618_v20  ;;  %v748_v5 = vand.u32 2147483648, %v1419_v9  ;;  %vm882_vm1 = vcmask 195712  }
 0x1d3   :  { %1133 = vpow2.f32 %v1055_v16  ;;  %v633_v22 = vmul.f32 %v1426_v18, %v1416_v7  ;;  %vm638_vm5 = vweird.f32 %v1426_v18  ;;  %vm1531_vm12 = vcmp.eq.f32.partialorder %v746_v1, 8.507059e+37 }
 0x1d4   :  { %1135 = vrcp.f32 %v1428_v19  ;;  %v620_v40 = vmul.f32 %v1423_v14, %v619_v25  ;;  %vm1514_vm8 = vmor %vm637_vm3, %vm638_vm5  ;;  %v656_v12 = vand.u32 2147483647, %v1428_v19  ;;  %vm652_vm14 = vweird.f32 %v1428_v19 }
 0x1d5   :  { %1137 = vpow2.f32 %v1061_v17  ;;  %v634_v31 = vsub.f32 1.0, %v633_v22 }
 0x1d6   :  { %v1435_v23 = vpop.eup %1131  ;;  %v519_v24 = vpop.xlane.xlu2 %518  ;;  %v621_v54 = vadd.f32 %v1423_v14, %v620_v40  ;;  %vm1549_vm15 = vcmp.eq.f32.partialorder %v656_v12, 8.507059e+37 }
 0x1d7   :  { %v547_v28 = vadd.f32 %v1407_v57, %v519_v24  ;;  %v738_v32 = vmul.f32 %v1435_v23, %v1419_v9  ;;  %v635_v48 = vmul.f32 %v1426_v18, %v634_v31  ;;  %vm743_vm9 = vweird.f32 %v1435_v23 }
 0x1d8   :  { %v625_v4 = vsel %vm1493_vm6, %v1423_v14, %v621_v54  ;;  %vm1544_vm13 = vmor %vm742_vm7, %vm743_vm9 }
 0x1d9   :  { %v1134_v29 = vpop.eup %1133  ;;  %v1062_v36 = vmul.f32 -1.442695, %v547_v28  ;;  %v739_v49 = vsub.f32 1.0, %v738_v32  ;;  %v636_v37 = vadd.f32 %v1426_v18, %v635_v48  ;;  %v658_v32 = vand.u32 2147483648, %v1428_v19 }
 0x1da   :  { %v1443_v33 = vpop.eup %1135  ;;  %v1448_v35 = vadd.f32 1.0, %v1134_v29  ;;  %v521_v38 = vpop.xlane.xlu1 %520  ;;  %v630_v29 = vsel %vm1470_vm2, %v629_v47, %v625_v4 }
 0x1db   :  { %v1138_v39 = vpop.eup %1137  ;;  %v648_v43 = vmul.f32 %v1443_v33, %v1428_v19  ;;  %v548_v52 = vadd.f32 %v1407_v57, %v521_v38  ;;  %v740_v61 = vmul.f32 %v1435_v23, %v739_v49  ;;  %v640_v14 = vsel %vm1514_vm8, %v1426_v18, %v636_v37 }
 0x1dc   :  { %1139 = vrcp.f32 %v1448_v35  ;;  %v1465_v51 = vadd.f32 1.0, %v1138_v39  ;;  %vm653_vm10 = vweird.f32 %v1443_v33  ;;  %v749_v18 = vor.u32 1.1754944e-38, %v748_v5 }
 0x1dd   :  { %v649_v50 = vsub.f32 1.0, %v648_v43  ;;  %1141 = vpow2.f32 %v1062_v36  ;;  %v1063_v62 = vmul.f32 -1.442695, %v548_v52  ;;  %v741_v15 = vadd.f32 %v1435_v23, %v740_v61  ;;  %vm1558_vm0 = vmor %vm652_vm14, %vm653_vm10 }
 0x1de   :  { %v507_v53 = vpop.xlane.xlu2 %506  ;;  %1143 = vrcp.f32 %v1465_v51  ;;  %v645_v36 = vsel %vm1478_vm4, %v644_v59, %v640_v14  ;;  %v671_v44 = vand.u32 2147483647, %v1448_v35  ;;  %v659_v49 = vor.u32 1.1754944e-38, %v658_v32 }
 0x1df   :  { %v650_v2 = vmul.f32 %v1443_v33, %v649_v50  ;;  %v541_v3 = vadd.f32 %v1407_v57, %v507_v53  ;;  %1145 = vpow2.f32 %v1063_v62  ;;  %v745_v43 = vsel %vm1544_vm13, %v1435_v23, %v741_v15 }
 0x1e0   :  { %v673_v23 = vand.u32 2147483648, %v1448_v35  ;;  %v1580_v53 = vsel %vm1531_vm12, %v749_v18, %v745_v43  ;;  %vm667_vm3 = vweird.f32 %v1448_v35  ;;  %vm886_vm4 = vcmask 261312  }
 0x1e1   :  { %v1056_v13 = vmul.f32 -1.442695, %v541_v3  ;;  %v651_v17 = vadd.f32 %v1443_v33, %v650_v2  ;;  %v761_v58 = vand.u32 2147483647, %v1465_v51  ;;  %v875_v37 = vperm.slane %v630_v29, %v1437_v27 }
 0x1e2   :  { %v1489_v63 = vpop.eup %1139  ;;  %v509_v8 = vpop.xlane.xlu1 %508  ;;  %vm672_vm6 = vcmp.eq.f32.partialorder %v671_v44, 8.507059e+37  ;;  %v763_v61 = vand.u32 2147483648, %v1465_v51  ;;  %v674_v0 = vor.u32 1.1754944e-38, %v673_v23  ;;  %v905_v5 = vperm.slane %v1580_v53, %v1453_v42 }
 0x1e3   :  { %v663_v26 = vmul.f32 %v1489_v63, %v1448_v35  ;;  %v1142_v10 = vpop.eup %1141  ;;  %1147 = vpow2.f32 %v1056_v13  ;;  %v542_v21 = vadd.f32 %v1407_v57, %v509_v8  ;;  %v655_v19 = vsel %vm1558_vm0, %v1443_v33, %v651_v17 }
 0x1e4   :  { %v1525_v7 = vpop.eup %1143  ;;  %v1528_v20 = vadd.f32 1.0, %v1142_v10  ;;  %vm668_vm2 = vweird.f32 %v1489_v63  ;;  %v877_v33 = vperm.slane %v645_v36, %v1446_v34  ;;  %v660_v54 = vsel %vm1549_vm15, %v659_v49, %v655_v19 }
 0x1e5   :  { %v664_v16 = vsub.f32 1.0, %v663_v26  ;;  %v753_v28 = vmul.f32 %v1525_v7, %v1465_v51  ;;  %v1057_v39 = vmul.f32 -1.442695, %v542_v21  ;;  %v1146_v41 = vpop.eup %1145  ;;  %vm1586_vm5 = vmor %vm667_vm3, %vm668_vm2  ;;  %vm758_vm7 = vweird.f32 %v1525_v7 }
 0x1e6   :  { %v523_v22 = vpop.xlane.xlu2 %522  ;;  %1149 = vrcp.f32 %v1528_v20  ;;  %v1573_v47 = vadd.f32 1.0, %v1146_v41  ;;  %v879_v4 = vsel %vm878_vm11, %v877_v33, %v875_v37  ;;  %vm757_vm8 = vweird.f32 %v1465_v51 }
 0x1e7   :  { %v665_v25 = vmul.f32 %v1489_v63, %v664_v16  ;;  %v754_v9 = vsub.f32 1.0, %v753_v28  ;;  %v549_v40 = vadd.f32 %v1407_v57, %v523_v22  ;;  %1151 = vpow2.f32 %v1057_v39  ;;  %vm1617_vm10 = vmor %vm757_vm8, %vm758_vm7 }
 0x1e8   :  { %1153 = vrcp.f32 %v1573_v47  ;;  %vm1608_vm9 = vcmp.eq.f32.partialorder %v761_v58, 8.507059e+37  ;;  %v764_v14 = vor.u32 1.1754944e-38, %v763_v61  ;;  %v778_v51 = vand.u32 2147483648, %v1528_v20 }
 0x1e9   :  { %v666_v45 = vadd.f32 %v1489_v63, %v665_v25  ;;  %v1148_v48 = vpop.eup %1147  ;;  %v755_v50 = vmul.f32 %v1525_v7, %v754_v9  ;;  %v1064_v52 = vmul.f32 -1.442695, %v549_v40  ;;  %v1625_v15 = vadd.s32 4294967264, %v1437_v27 }
 0x1ea   :  { %v1591_v59 = vadd.f32 1.0, %v1148_v48  ;;  %v1637_v25 = vadd.s32 4294967256, %v1437_v27  ;;  %v1640_v28 = vadd.s32 4294967208, %v1437_v27  ;;  %v793_v30 = vand.u32 2147483648, %v1573_v47 }
 0x1eb   :  { %1155 = vpow2.f32 %v1064_v52  ;;  %v670_v35 = vsel %vm1586_vm5, %v1489_v63, %v666_v45  ;;  %v756_v1 = vadd.f32 %v1525_v7, %v755_v50  ;;  %v881_v63 = vperm.slane %v660_v54, %v1460_v46 }
 0x1ec   :  { %v1598_v62 = vpop.eup %1149  ;;  %1157 = vrcp.f32 %v1591_v59  ;;  %v675_v26 = vsel %vm672_vm6, %v674_v0, %v670_v35  ;;  %v1652_v38 = vor.u32 1.1754944e-38, %v778_v51  ;;  %vm772_vm11 = vweird.f32 %v1528_v20 }
 0x1ed   :  { %v1152_v3 = vpop.eup %1151  ;;  %v768_v46 = vmul.f32 %v1598_v62, %v1528_v20  ;;  %v760_v17 = vsel %vm1617_vm10, %v1525_v7, %v756_v1  ;;  %v883_v24 = vsel %vm882_vm1, %v881_v63, %v879_v4  ;;  %v885_v18 = vperm.slane %v675_v26, %v1476_v56 }
 0x1ee   :  { %v511_v34 = vpop.xlane.xlu2 %510  ;;  %v513_v2 = vpop.xlane.xlu1 %512  ;;  %v1612_v10 = vadd.f32 1.0, %v1152_v3  ;;  %v776_v7 = vand.u32 2147483647, %v1528_v20  ;;  %v1650_v36 = vsel %vm1608_vm9, %v764_v14, %v760_v17  ;;  %v1659_v41 = vadd.s32 4294967248, %v1437_v27 }
 0x1ef   :  { %v543_v11 = vadd.f32 %v1407_v57, %v511_v34  ;;  %v1615_v12 = vpop.eup %1153  ;;  %v544_v22 = vadd.f32 %v1407_v57, %v513_v2  ;;  %v769_v56 = vsub.f32 1.0, %v768_v46  ;;  %v1662_v19 = vsel %vm886_vm4, %v885_v18, %v883_v24 }
 0x1f0   :  { %v783_v21 = vmul.f32 %v1615_v12, %v1573_v47  ;;  %1159 = vrcp.f32 %v1612_v10  ;;  %vm773_vm12 = vweird.f32 %v1598_v62  ;;  %v791_v44 = vand.u32 2147483647, %v1573_v47 }
 0x1f1   :  { %v1156_v16 = vpop.eup %1155  ;;  %v1058_v32 = vmul.f32 -1.442695, %v543_v11  ;;  %v1059_v43 = vmul.f32 -1.442695, %v544_v22  ;;  %v909_v49 = vperm.slane %v1650_v36, %v1483_v60  ;;  %vm787_vm13 = vweird.f32 %v1573_v47  ;;  %vm1717_vm7 = vmor %vm772_vm11, %vm773_vm12 }
 0x1f2   :  { %v1642_v29 = vpop.eup %1157  ;;  %v1646_v31 = vadd.f32 1.0, %v1156_v16  ;;  %v784_v40 = vsub.f32 1.0, %v783_v21  ;;  %v1671_v23 = vor.u32 1.1754944e-38, %v793_v30  ;;  %v770_v33 = vmul.f32 %v1598_v62, %v769_v56 }
 0x1f3   :  { %v678_v9 = vmul.f32 %v1642_v29, %v1591_v59  ;;  %vm682_vm14 = vweird.f32 %v1591_v59  ;;  %v686_v37 = vand.u32 2147483647, %v1591_v59  ;;  %vm1681_vm15 = vcmp.eq.f32.partialorder %v776_v7, 8.507059e+37 }
 0x1f4   :  { %1161 = vrcp.f32 %v1646_v31  ;;  %v785_v34 = vmul.f32 %v1615_v12, %v784_v40  ;;  %vm683_vm0 = vweird.f32 %v1642_v29  ;;  %vm788_vm1 = vweird.f32 %v1615_v12 }
 0x1f5   :  { %v679_v45 = vsub.f32 1.0, %v678_v9  ;;  %1163 = vpow2.f32 %v1058_v32  ;;  %vm1691_vm2 = vcmp.eq.f32.partialorder %v791_v44, 8.507059e+37  ;;  %v688_v63 = vand.u32 2147483648, %v1591_v59  ;;  %vm1706_vm6 = vmor %vm682_vm14, %vm683_vm0 }
 0x1f6   :  { %v527_v39 = vpop.xlane.xlu2 %526  ;;  %v1666_v48 = vpop.eup %1159  ;;  %1165 = vpow2.f32 %v1059_v43  ;;  %v771_v8 = vadd.f32 %v1598_v62, %v770_v33  ;;  %vm697_vm3 = vweird.f32 %v1612_v10  ;;  %v786_v14 = vadd.f32 %v1615_v12, %v785_v34  ;;  %vm1743_vm11 = vmor %vm787_vm13, %vm788_vm1 }
 0x1f7   :  { %v551_v50 = vadd.f32 %v1407_v57, %v527_v39  ;;  %v525_v52 = vpop.xlane.xlu1 %524  ;;  %v680_v54 = vmul.f32 %v1642_v29, %v679_v45  ;;  %v693_v55 = vmul.f32 %v1666_v48, %v1612_v10  ;;  %vm698_vm4 = vweird.f32 %v1666_v48 }
 0x1f8   :  { %v550_v2 = vadd.f32 %v1407_v57, %v525_v52  ;;  %vm890_vm5 = vcmask 326912   ;;  %v701_v22 = vand.u32 2147483647, %v1612_v10  ;;  %vm687_vm8 = vcmp.eq.f32.partialorder %v686_v37, 8.507059e+37  ;;  %vm1732_vm10 = vmor %vm697_vm3, %vm698_vm4 }
 0x1f9   :  { %v1066_v35 = vmul.f32 -1.442695, %v551_v50  ;;  %v681_v0 = vadd.f32 %v1642_v29, %v680_v54  ;;  %v694_v1 = vsub.f32 1.0, %v693_v55  ;;  %v689_v7 = vor.u32 1.1754944e-38, %v688_v63 }
 0x1fa   :  { %v529_v58 = vpop.xlane.xlu0 %528  ;;  %v1688_v3 = vpop.eup %1161  ;;  %v1065_v16 = vmul.f32 -1.442695, %v550_v2  ;;  %vm894_vm9 = vcmask 392512   ;;  %v775_v30 = vsel %vm1717_vm7, %v1598_v62, %v771_v8  ;;  %v1752_v56 = vadd.s32 4294967240, %v1437_v27 }
 0x1fb   :  { %1167 = vpow2.f32 %v1066_v35  ;;  %v552_v26 = vadd.f32 %v1407_v57, %v529_v58  ;;  %v695_v11 = vmul.f32 %v1666_v48, %v694_v1  ;;  %v1164_v13 = vpop.eup %1163  ;;  %v703_v57 = vand.u32 2147483648, %v1612_v10 }
 0x1fc   :  { %v798_v51 = vmul.f32 %v1688_v3, %v1646_v31  ;;  %v685_v59 = vsel %vm1706_vm6, %v1642_v29, %v681_v0  ;;  %v1726_v24 = vadd.f32 1.0, %v1164_v13  ;;  %v1166_v18 = vpop.eup %1165  ;;  %1169 = vpow2.f32 %v1065_v16 }
 0x1fd   :  { %v696_v21 = vadd.f32 %v1666_v48, %v695_v11  ;;  %v1067_v29 = vmul.f32 -1.442695, %v552_v26  ;;  %v790_v62 = vsel %vm1743_vm11, %v1615_v12, %v786_v14  ;;  %v690_v39 = vsel %vm687_vm8, %v689_v7, %v685_v59 }
 0x1fe   :  { %1171 = vrcp.f32 %v1726_v24  ;;  %v704_v47 = vor.u32 1.1754944e-38, %v703_v57  ;;  %v799_v40 = vsub.f32 1.0, %v798_v51  ;;  %vm702_vm12 = vcmp.eq.f32.partialorder %v701_v22, 8.507059e+37 }
 0x1ff   :  { %v700_v10 = vsel %vm1732_vm10, %v1666_v48, %v696_v21  ;;  %v1757_v43 = vadd.f32 1.0, %v1166_v18  ;;  %v1762_v45 = vadd.s32 4294967200, %v1437_v27  ;;  %v1767_v48 = vsel %vm1681_vm15, %v1652_v38, %v775_v30 }
 0x200   :  { %v705_v50 = vsel %vm702_vm12, %v704_v47, %v700_v10  ;;  %v808_v52 = vand.u32 2147483648, %v1646_v31  ;;  %1173 = vpow2.f32 %v1067_v29  ;;  %v1773_v12 = vsel %vm1691_vm2, %v1671_v23, %v790_v62 }
 0x201   :  { %v1168_v9 = vpop.eup %1167  ;;  %v889_v33 = vperm.slane %v690_v39, %v1625_v15  ;;  %v806_v54 = vand.u32 2147483647, %v1646_v31  ;;  %1175 = vrcp.f32 %v1757_v43  ;;  %v800_v58 = vmul.f32 %v1688_v3, %v799_v40 }
 0x202   :  { %v1759_v44 = vadd.f32 1.0, %v1168_v9  ;;  %v1170_v55 = vpop.eup %1169  ;;  %v716_v38 = vand.u32 2147483647, %v1726_v24  ;;  %v718_v34 = vand.u32 2147483648, %v1726_v24  ;;  %v913_v23 = vperm.slane %v1767_v48, %v1508_v6 }
 0x203   :  { %v893_v35 = vperm.slane %v705_v50, %v1637_v25  ;;  %vm802_vm13 = vweird.f32 %v1646_v31  ;;  %v1786_v15 = vadd.f32 1.0, %v1170_v55  ;;  %vm803_vm14 = vweird.f32 %v1688_v3 }
 0x204   :  { %1177 = vrcp.f32 %v1759_v44  ;;  %v1172_v37 = vpop.eup %1171  ;;  %v809_v61 = vor.u32 1.1754944e-38, %v808_v52  ;;  %v917_v1 = vperm.slane %v1773_v12, %v1640_v28  ;;  %v891_v2 = vsel %vm890_vm5, %v889_v33, %v1662_v19  ;;  %vm1819_vm5 = vmor %vm802_vm13, %vm803_vm14 }
 0x205   :  { %v708_v0 = vmul.f32 %v1172_v37, %v1726_v24  ;;  %vm712_vm15 = vweird.f32 %v1726_v24  ;;  %v731_v4 = vand.u32 2147483647, %v1757_v43  ;;  %1179 = vrcp.f32 %v1786_v15 }
 0x206   :  { %v1174_v25 = vpop.eup %1173  ;;  %v801_v63 = vadd.f32 %v1688_v3, %v800_v58  ;;  %vm1798_vm0 = vcmp.eq.f32.partialorder %v806_v54, 8.507059e+37  ;;  %vm898_vm1 = vcmask 458112   ;;  %vm1802_vm2 = vcmp.eq.f32.partialorder %v716_v38, 8.507059e+37 }
 0x207   :  { %v709_v8 = vsub.f32 1.0, %v708_v0  ;;  %v719_v19 = vor.u32 1.1754944e-38, %v718_v34  ;;  %v1176_v13 = vpop.eup %1175  ;;  %v895_v14 = vsel %vm894_vm9, %v893_v35, %v891_v2  ;;  %v733_v46 = vand.u32 2147483648, %v1757_v43 }
 0x208   :  { %v838_v57 = vand.u32 2147483648, %v1759_v44  ;;  %v1809_v51 = vadd.f32 1.0, %v1174_v25  ;;  %vm713_vm3 = vweird.f32 %v1172_v37  ;;  %v723_v59 = vmul.f32 %v1176_v13, %v1757_v43 }
 0x209   :  { %v710_v17 = vmul.f32 %v1172_v37, %v709_v8  ;;  %vm727_vm4 = vweird.f32 %v1757_v43  ;;  %vm1823_vm6 = vcmp.eq.f32.partialorder %v731_v4, 8.507059e+37  ;;  %vm832_vm7 = vweird.f32 %v1759_v44  ;;  %vm714_vm10 = vmor %vm712_vm15, %vm713_vm3 }
 0x20a   :  { %v1811_v16 = vpop.eup %1177  ;;  %1181 = vrcp.f32 %v1809_v51  ;;  %vm902_vm8 = vcmask 523712   ;;  %v724_v20 = vsub.f32 1.0, %v723_v59  ;;  %v805_v31 = vsel %vm1819_vm5, %v1688_v3, %v801_v63 }
 0x20b   :  { %v828_v18 = vmul.f32 %v1811_v16, %v1759_v44  ;;  %v711_v7 = vadd.f32 %v1172_v37, %v710_v17  ;;  %v836_v29 = vand.u32 2147483647, %v1759_v44  ;;  %vm906_vm9 = vcmask 589312   ;;  %v1180_v30 = vpop.eup %1179 }
 0x20c   :  { %v734_v32 = vor.u32 1.1754944e-38, %v733_v46  ;;  %v839_v9 = vor.u32 1.1754944e-38, %v838_v57  ;;  %vm817_vm11 = vweird.f32 %v1786_v15  ;;  %vm910_vm12 = vcmask 654912  }
 0x20d   :  { %v829_v10 = vsub.f32 1.0, %v828_v18  ;;  %v715_v62 = vsel %vm714_vm10, %v1172_v37, %v711_v7  ;;  %v725_v39 = vmul.f32 %v1176_v13, %v724_v20  ;;  %vm728_vm13 = vweird.f32 %v1176_v13 }
 0x20e   :  { %v813_v47 = vmul.f32 %v1180_v30, %v1786_v15  ;;  %vm914_vm14 = vcmask 720512   ;;  %v720_v3 = vsel %vm1802_vm2, %v719_v19, %v715_v62  ;;  %v821_v24 = vand.u32 2147483647, %v1786_v15  ;;  %vm729_vm10 = vmor %vm727_vm4, %vm728_vm13 }
 0x20f   :  { %v830_v40 = vmul.f32 %v1811_v16, %v829_v10  ;;  %vm833_vm15 = vweird.f32 %v1811_v16  ;;  %v897_v50 = vperm.slane %v720_v3, %v1659_v41  ;;  %v726_v52 = vadd.f32 %v1176_v13, %v725_v39 }
 0x210   :  { %v814_v33 = vsub.f32 1.0, %v813_v47  ;;  %v823_v54 = vand.u32 2147483648, %v1786_v15  ;;  %vm922_vm5 = vcmask 851712   ;;  %v1182_v55 = vpop.eup %1181  ;;  %v810_v58 = vsel %vm1798_vm0, %v809_v61, %v805_v31  ;;  %vm1862_vm4 = vmor %vm832_vm7, %vm833_vm15 }
 0x211   :  { %v831_v38 = vadd.f32 %v1811_v16, %v830_v40  ;;  %vm1852_vm2 = vcmp.eq.f32.partialorder %v836_v29, 8.507059e+37  ;;  %v924_v41 = vadd.s32 4294967192, %v1437_v27  ;;  %v730_v37 = vsel %vm729_vm10, %v1176_v13, %v726_v52 }
 0x212   :  { %v815_v35 = vmul.f32 %v1180_v30, %v814_v33  ;;  %vm818_vm3 = vweird.f32 %v1180_v30  ;;  %v843_v0 = vmul.f32 %v1182_v55, %v1809_v51  ;;  %v899_v61 = vsel %vm898_vm1, %v897_v50, %v895_v14 }
 0x213   :  { %v735_v2 = vsel %vm1823_vm6, %v734_v32, %v730_v37  ;;  %vm822_vm0 = vcmp.eq.f32.partialorder %v821_v24, 8.507059e+37  ;;  %v835_v4 = vsel %vm1862_vm4, %v1811_v16, %v831_v38  ;;  %v824_v26 = vor.u32 1.1754944e-38, %v823_v54  ;;  %vm819_vm7 = vmor %vm817_vm11, %vm818_vm3 }
 0x214   :  { %v901_v25 = vperm.slane %v735_v2, %v1752_v56  ;;  %v816_v63 = vadd.f32 %v1180_v30, %v815_v35  ;;  %v844_v8 = vsub.f32 1.0, %v843_v0  ;;  %vm848_vm13 = vweird.f32 %v1182_v55 }
 0x215   :  { %v851_v44 = vand.u32 2147483647, %v1809_v51  ;;  %v853_v11 = vand.u32 2147483648, %v1809_v51  ;;  %v928_v19 = vadd.s32 4294967184, %v1437_v27  ;;  %v840_v46 = vsel %vm1852_vm2, %v839_v9, %v835_v4 }
 0x216   :  { %v845_v13 = vmul.f32 %v1182_v55, %v844_v8  ;;  %v820_v14 = vsel %vm819_vm7, %v1180_v30, %v816_v63  ;;  %v903_v56 = vsel %vm902_vm8, %v901_v25, %v899_v61  ;;  %vm847_vm1 = vweird.f32 %v1809_v51 }
 0x217   :  { %v825_v57 = vsel %vm822_vm0, %v824_v26, %v820_v14  ;;  %v907_v15 = vsel %vm906_vm9, %v905_v5, %v903_v56  ;;  %v921_v16 = vperm.slane %v810_v58, %v1762_v45  ;;  %v932_v22 = vadd.s32 4294967176, %v1437_v27  ;;  %vm849_vm6 = vmor %vm847_vm1, %vm848_vm13 }
 0x218   :  { %v846_v17 = vadd.f32 %v1182_v55, %v845_v13  ;;  %v911_v59 = vsel %vm910_vm12, %v909_v49, %v907_v15  ;;  %v925_v21 = vperm.slane %v825_v57, %v924_v41  ;;  %v854_v18 = vor.u32 1.1754944e-38, %v853_v11 }
 0x219   :  { %v915_v42 = vsel %vm914_vm14, %v913_v23, %v911_v59  ;;  %vm926_vm8 = vcmask 917312   ;;  %v929_v53 = vperm.slane %v840_v46, %v928_v19  ;;  %vm852_vm9 = vcmp.eq.f32.partialorder %v851_v44, 8.507059e+37 }
 0x21a   :  { %v850_v5 = vsel %vm849_vm6, %v1182_v55, %v846_v17  ;;  %vm1959_vm11 = vcmask 786112   ;;  %vm930_vm12 = vcmask 982912   ;;  %vm934_vm14 = vcmask 1048512  }
 0x21b   :  { %v919_v60 = vsel %vm1959_vm11, %v917_v1, %v915_v42  ;;  %v855_v27 = vsel %vm852_vm9, %v854_v18, %v850_v5 }
 0x21c   :  { %v923_v6 = vsel %vm922_vm5, %v921_v16, %v919_v60  ;;  %v933_v49 = vperm.slane %v855_v27, %v932_v22 }
 0x21d   :  { %v927_v36 = vsel %vm926_vm8, %v925_v21, %v923_v6 }
 0x21e   :  { %v931_v45 = vsel %vm930_vm12, %v929_v53, %v927_v36 }
 0x21f   :  { %v935_v48 = vsel %vm934_vm14, %v933_v49, %v931_v45 }
 0x220   :  { %937 = vst [vmem:[#allocation9] sm:$0x1] %v935_v48 }
 0x221   :  { %948 = dma.vmem_to_hbm [thread:$0]  %s944_s5, 16, %s946_s23, [#allocation5]  }
 0x222   :  { %1283 = dma.done.wait [#allocation5], 16  }
 0x223   :  { %1284 = vsyncadd [#allocation5], 4294967280 }
 0x224   :  { %953 = vsyncpa [#allocation4], 1 }
 0x225   :  { %954 = vsyncpa [#allocation7], 1 }
 0x226   :  { %955 = vsyncpa [#allocation5], 1 }

</bundles_post_ra>
